<compile_context>
chip_gen: v5e
topology: v5e:2x2
jax: 0.10.0
libtpu: 0.0.40
codegen_flags: <defaults>
</compile_context>

<pallas_src>
import jax
import jax.numpy as jnp
from jax.experimental import pallas as pl
from jax.experimental.pallas import tpu as pltpu


def _round_up(x, m):
    return (x + m - 1) // m * m


def _cdiv(a, b):
    return (a + b - 1) // b


# ----------------------------- hardware budget ------------------------------

def _tpu_budget():
    """(vmem_capacity_bytes, tensorcores_per_chip) with safe fallbacks."""
    vmem_cap = 64 * 1024 * 1024          # conservative fallback = v7x per-TC VMEM
    num_cores = 1
    try:
        info = pltpu.get_tpu_info()
        vmem_cap = int(getattr(info, "vmem_capacity_bytes", vmem_cap))
    except Exception:
        pass
    try:
        kind = jax.devices()[0].device_kind.lower()
        if "v7" in kind:
            num_cores = 2                # 2 TensorCores per chip on v7x
    except Exception:
        pass
    return vmem_cap, num_cores


def _vmem_bytes(tm, tf, h_pad, in_bytes, out_bytes):
    """Explicit + implicit VMEM consumers for one grid step."""
    x_buf = 2 * tm * h_pad * in_bytes          # double-buffered input tile
    w1_buf = 2 * h_pad * tf * in_bytes
    w2_buf = 2 * tf * h_pad * in_bytes
    o_buf = 2 * tm * h_pad * out_bytes
    acc = tm * h_pad * 4                       # f32 accumulator scratch
    h_tmp = tm * tf * (4 + in_bytes)           # f32 h temporary + its cast
    return x_buf + w1_buf + w2_buf + o_buf + acc + h_tmp


def _pick_tiles(M, hidden, ffn, in_bytes, out_bytes, vmem_budget, num_cores):
    pack = max(8, 32 // in_bytes)              # sublane packing for compute dtype
    h_pad = _round_up(hidden, 128)             # lane-dense output stores

    # Row tile: weight-stream intensity is 2*tm/in_bytes FLOP per weight byte.
    # bf16 needs tm >= ~640 to be MXU-bound on v6e; aim high, cap by M.
    tm_target = 1024 if in_bytes <= 2 else 512
    tm = min(_round_up(tm_target, pack), _round_up(M, pack))

    # Keep both TensorCores fed on megacore parts (v7x) when M allows.
    if num_cores > 1 and M >= num_cores * pack:
        tm = min(tm, _round_up(_cdiv(M, num_cores), pack))

    grid_m = _cdiv(_round_up(M, tm), tm)

    # ffn tile: single row tile (decode) => purely weight-BW bound => big tf.
    tf_target = 2048 if grid_m == 1 else 512
    tf = min(_round_up(tf_target, 128), _round_up(ffn, 128))

    # Shrink until the footprint (incl. compiler-internal h temp) fits budget.
    while _vmem_bytes(tm, tf, h_pad, in_bytes, out_bytes) > vmem_budget and tf > 128:
        tf = _round_up(max(128, tf // 2), 128)
    while _vmem_bytes(tm, tf, h_pad, in_bytes, out_bytes) > vmem_budget and tm > pack:
        tm = _round_up(max(pack, tm // 2), pack)

    return tm, tf, h_pad


# --------------------------------- kernel -----------------------------------

def _mlp_kernel(x_ref, w1_ref, w2_ref, o_ref, acc_ref):
    # x_ref : (tm, H_pad)      activation row tile (constant along ffn axis)
    # w1_ref: (H_pad, tf)      contiguous ffn-column slab of pre-blocked w1
    # w2_ref: (tf, H_pad)      ffn-row tile of w2
    # o_ref : (tm, H_pad)      output row tile (written on last ffn step)
    # acc_ref:(tm, H_pad) f32  accumulator, resident across the ffn axis
    f = pl.program_id(1)

    @pl.when(f == 0)
    def _init():
        acc_ref[...] = jnp.zeros_like(acc_ref)

    h = jnp.dot(x_ref[...], w1_ref[...], preferred_element_type=jnp.float32)
    h = h * jax.nn.sigmoid(h)                      # SiLU in f32 (EUP + VPU)
    acc_ref[...] += jnp.dot(h.astype(w2_ref.dtype), w2_ref[...],
                            preferred_element_type=jnp.float32)

    @pl.when(f == pl.num_programs(1) - 1)
    def _finalize():
        o_ref[...] = acc_ref[...].astype(o_ref.dtype)


# ------------------------------ weight prep ---------------------------------

def prepare_weights(w1, w2, *, tf, compute_dtype=None):
    """Pad + pre-block weights ONCE (do this at init, not per forward call).

    w1: (hidden, ffn)  -- transpose of PyTorch nn.Linear.weight
    w2: (ffn, hidden)
    Returns a dict holding w1 blocked as (F_pad//tf, H_pad, tf) so each kernel
    tile is one contiguous HBM slab, and w2 padded to (F_pad, H_pad).
    """
    hidden, ffn = w1.shape
    assert w2.shape == (ffn, hidden)
    if compute_dtype is not None:
        w1 = w1.astype(compute_dtype)
        w2 = w2.astype(compute_dtype)

    h_pad = _round_up(hidden, 128)
    f_pad = _round_up(ffn, tf)
    if (h_pad, f_pad) != (hidden, ffn):
        w1 = jnp.pad(w1, ((0, h_pad - hidden), (0, f_pad - ffn)))
        w2 = jnp.pad(w2, ((0, f_pad - ffn), (0, h_pad - hidden)))

    w1_blocked = w1.reshape(h_pad, f_pad // tf, tf).transpose(1, 0, 2)
    return dict(w1=w1_blocked, w2=w2, hidden=hidden, ffn=ffn,
                H_pad=h_pad, F_pad=f_pad, tf=tf)


# -------------------------------- forward -----------------------------------

def mlp_forward(hidden_states, prepared, *, tm=None, compute_dtype=None):
    batch, seq, hidden = hidden_states.shape
    assert hidden == prepared["hidden"]
    out_dtype = hidden_states.dtype

    x = hidden_states
    if compute_dtype is not None:
        x = x.astype(compute_dtype)

    h_pad, f_pad, tf = prepared["H_pad"], prepared["F_pad"], prepared["tf"]
    w1_b, w2_p = prepared["w1"], prepared["w2"]

    M = batch * seq
    in_bytes = x.dtype.itemsize
    out_bytes = jnp.dtype(out_dtype).itemsize
    vmem_cap, num_cores = _tpu_budget()
    if tm is None:
        tm, _, _ = _pick_tiles(M, hidden, prepared["ffn"], in_bytes, out_bytes,
                               int(vmem_cap * 0.75), num_cores)

    m_pad = _round_up(M, tm)
    x2d = x.reshape(M, hidden)
    if (m_pad, h_pad) != (M, hidden):          # fast path: skip pad when aligned
        x2d = jnp.pad(x2d, ((0, m_pad - M), (0, h_pad - hidden)))

    grid = (m_pad // tm, f_pad // tf)

    # Advisory cost estimate; weights are re-streamed once per M row tile.
    w_bytes = (w1_b.size + w2_p.size) * w1_b.dtype.itemsize
    bytes_accessed = (x2d.size * x2d.dtype.itemsize
                      + grid[0] * w_bytes
                      + m_pad * h_pad * out_bytes)
    cost = pl.CostEstimate(
        flops=4 * m_pad * h_pad * f_pad,       # two matmuls
        transcendentals=m_pad * f_pad,         # sigmoid
        bytes_accessed=int(bytes_accessed),
    )

    # Derive the VMEM limit from the chip instead of a fixed 64 MiB
    # (64 MiB is the *entire* per-TC VMEM on v7x; v5e/v6e have 128 MiB).
    vmem_limit = min(int(vmem_cap * 0.9), 100 * 1024 * 1024)

    out2d = pl.pallas_call(
        _mlp_kernel,
        out_shape=jax.ShapeDtypeStruct((m_pad, h_pad), out_dtype),
        grid_spec=pltpu.PrefetchScalarGridSpec(
            num_scalar_prefetch=0,
            grid=grid,
            in_specs=[
                # activation row tile: constant along the ffn axis
                pl.BlockSpec((tm, h_pad), lambda i, f: (i, 0)),
                # pre-blocked w1: one contiguous (H_pad, tf) slab per ffn step
                pl.BlockSpec((None, h_pad, tf), lambda i, f: (f, 0, 0)),
                # w2 ffn-row tile (already contiguous)
                pl.BlockSpec((tf, h_pad), lambda i, f: (f, 0)),
            ],
            out_specs=pl.BlockSpec((tm, h_pad), lambda i, f: (i, 0)),
            scratch_shapes=[pltpu.VMEM((tm, h_pad), jnp.float32)],
        ),
        compiler_params=pltpu.CompilerParams(
            dimension_semantics=("parallel", "arbitrary"),
            vmem_limit_bytes=vmem_limit,
        ),
        cost_estimate=cost,
    )(x2d, w1_b, w2_p)

    if (m_pad, h_pad) != (M, hidden):
        out2d = out2d[:M, :hidden]
    return out2d.reshape(batch, seq, hidden)


def vanilla_mlp(hidden_states, w1, w2, *, compute_dtype=None, tm=None, tf=None):
    """Convenience wrapper: prepares weights and runs the forward pass.

    hidden_states: (batch, seq, hidden)
    w1: (hidden, ffn)   -- transpose of PyTorch nn.Linear.weight
    w2: (ffn, hidden)
    compute_dtype: MXU feed dtype; defaults to bf16 when inputs are bf16
                   (accumulation stays f32, output keeps hidden_states.dtype).
    """
    batch, seq, hidden = hidden_states.shape
    ffn = w1.shape[1]
    assert w1.shape == (hidden, ffn)
    assert w2.shape == (ffn, hidden)

    if compute_dtype is None and hidden_states.dtype == jnp.bfloat16:
        compute_dtype = jnp.bfloat16

    in_dtype = compute_dtype if compute_dtype is not None else hidden_states.dtype
    in_bytes = jnp.dtype(in_dtype).itemsize
    out_bytes = jnp.dtype(hidden_states.dtype).itemsize
    vmem_cap, num_cores = _tpu_budget()
    tm_auto, tf_auto, _ = _pick_tiles(batch * seq, hidden, ffn, in_bytes,
                                      out_bytes, int(vmem_cap * 0.75), num_cores)
    tm = tm if tm is not None else tm_auto
    tf = tf if tf is not None else tf_auto

    prepared = prepare_weights(w1, w2, tf=tf, compute_dtype=compute_dtype)
    return mlp_forward(hidden_states, prepared, tm=tm, compute_dtype=compute_dtype)


def reference_mlp(hidden_states, w1, w2):
    h = jnp.einsum("bsh,hf->bsf", hidden_states, w1)
    h = h * jax.nn.sigmoid(h)
    return jnp.einsum("bsf,fh->bsh", h, w2)


if __name__ == "__main__":
    # Small config consistent with the module: hidden_size=32, intermediate_size=64.
    batch, seq, hidden, ffn = 2, 8, 32, 64

    key = jax.random.PRNGKey(0)
    kx, k1, k2 = jax.random.split(key, 3)

    x = jax.random.normal(kx, (batch, seq, hidden), dtype=jnp.float32)
    # PyTorch stores (out_features, in_features); pass the transpose.
    w1_pt = jax.random.normal(k1, (ffn, hidden), dtype=jnp.float32) * 0.05
    w2_pt = jax.random.normal(k2, (hidden, ffn), dtype=jnp.float32) * 0.05
    w1 = w1_pt.T  # (hidden, ffn)
    w2 = w2_pt.T  # (ffn, hidden)

    # f32 end-to-end correctness check against the pure-JAX reference.
    out = jax.block_until_ready(vanilla_mlp(x, w1, w2))
    ref = reference_mlp(x, w1, w2)
    assert out.shape == (batch, seq, hidden)
    assert jnp.allclose(out, ref, atol=1e-5, rtol=1e-5), "f32 mismatch vs reference"

    # Exercise the bf16 MXU-feed path as well (f32 accumulation, loose tolerance).
    out_bf16 = jax.block_until_ready(
        vanilla_mlp(x, w1, w2, compute_dtype=jnp.bfloat16))
    assert out_bf16.shape == (batch, seq, hidden)
    assert jnp.allclose(out_bf16, ref, atol=5e-2, rtol=5e-2), "bf16 mismatch"

    print("KERNEL_OK")
</pallas_src>

<mosaic_0001>
module attributes {stable_mosaic.version = 11 : i64} {
  func.func @_mlp_kernel(%arg0: i32, %arg1: i32, %arg2: memref<16x128xf32, #tpu.memory_space<vmem>>, %arg3: memref<1x128x128xf32, #tpu.memory_space<vmem>>, %arg4: memref<128x128xf32, #tpu.memory_space<vmem>>, %arg5: memref<16x128xf32, #tpu.memory_space<vmem>>, %arg6: memref<16x128xf32, #tpu.memory_space<vmem>>) attributes {dimension_semantics = [#tpu.dimension_semantics<parallel>, #tpu.dimension_semantics<arbitrary>], iteration_bounds = array<i64: 1, 1>, scalar_prefetch = 0 : i64, scratch_operands = 1 : i64, tpu.core_type = #tpu.core_type<tc>, window_params = [{transform_indices = @transform_0, window_bounds = array<i64: 16, 128>}, {transform_indices = @transform_1, window_bounds = array<i64: 1, 128, 128>}, {transform_indices = @transform_2, window_bounds = array<i64: 128, 128>}, {transform_indices = @transform_3, window_bounds = array<i64: 16, 128>}]} {
    %c0_i32 = arith.constant 0 : i32
    %0 = arith.cmpi eq, %arg1, %c0_i32 : i32
    %1 = arith.extui %0 : i1 to i32
    %c0_i32_0 = arith.constant 0 : i32
    %2 = arith.cmpi ne, %1, %c0_i32_0 : i32
    scf.if %2 {
      %cst_15 = arith.constant 0.000000e+00 : f32
      %21 = vector.broadcast %cst_15 : f32 to vector<16x128xf32>
      %c0_16 = arith.constant 0 : index
      %c0_17 = arith.constant 0 : index
      %22 = vector.load %arg6[%c0_16, %c0_17] : memref<16x128xf32, #tpu.memory_space<vmem>>, vector<16x128xf32>
      tpu.vector_store %arg6[%c0_16, %c0_17], %21 {strides = array<i32>} : memref<16x128xf32, #tpu.memory_space<vmem>>, vector<16x128xf32>,
    } else {
    }
    %c0 = arith.constant 0 : index
    %c0_1 = arith.constant 0 : index
    %3 = vector.load %arg2[%c0, %c0_1] : memref<16x128xf32, #tpu.memory_space<vmem>>, vector<16x128xf32>
    %c0_2 = arith.constant 0 : index
    %c0_3 = arith.constant 0 : index
    %c0_4 = arith.constant 0 : index
    %4 = vector.load %arg3[%c0_2, %c0_3, %c0_4] : memref<1x128x128xf32, #tpu.memory_space<vmem>>, vector<1x128x128xf32>
    %5 = vector.shape_cast %4 : vector<1x128x128xf32> to vector<128x128xf32>
    %cst = arith.constant dense<0.000000e+00> : vector<16x128xf32>
    %6 = tpu.matmul %3, %5, %cst {dimension_numbers = #tpu.dot_dimension_numbers<[1], [0], [0], [1], [0, 0, 1, 1], [], []>} : vector<16x128xf32>, vector<128x128xf32>, vector<16x128xf32> -> vector<16x128xf32>
    %7 = arith.negf %6 : vector<16x128xf32>
    %8 = math.exp %7 : vector<16x128xf32>
    %cst_5 = arith.constant 1.000000e+00 : f32
    %9 = vector.broadcast %cst_5 : f32 to vector<16x128xf32>
    %10 = arith.addf %9, %8 : vector<16x128xf32>
    %11 = arith.divf %9, %10 : vector<16x128xf32>
    %12 = arith.mulf %6, %11 : vector<16x128xf32>
    %c0_6 = arith.constant 0 : index
    %c0_7 = arith.constant 0 : index
    %13 = vector.load %arg6[%c0_6, %c0_7] : memref<16x128xf32, #tpu.memory_space<vmem>>, vector<16x128xf32>
    %c0_8 = arith.constant 0 : index
    %c0_9 = arith.constant 0 : index
    %14 = vector.load %arg4[%c0_8, %c0_9] : memref<128x128xf32, #tpu.memory_space<vmem>>, vector<128x128xf32>
    %cst_10 = arith.constant dense<0.000000e+00> : vector<16x128xf32>
    %15 = tpu.matmul %12, %14, %cst_10 {dimension_numbers = #tpu.dot_dimension_numbers<[1], [0], [0], [1], [0, 0, 1, 1], [], []>} : vector<16x128xf32>, vector<128x128xf32>, vector<16x128xf32> -> vector<16x128xf32>
    %16 = arith.addf %13, %15 : vector<16x128xf32>
    %c0_11 = arith.constant 0 : index
    %c0_12 = arith.constant 0 : index
    %17 = vector.load %arg6[%c0_11, %c0_12] : memref<16x128xf32, #tpu.memory_space<vmem>>, vector<16x128xf32>
    tpu.vector_store %arg6[%c0_11, %c0_12], %16 {strides = array<i32>} : memref<16x128xf32, #tpu.memory_space<vmem>>, vector<16x128xf32>,
    %c0_i32_13 = arith.constant 0 : i32
    %18 = arith.cmpi eq, %arg1, %c0_i32_13 : i32
    %19 = arith.extui %18 : i1 to i32
    %c0_i32_14 = arith.constant 0 : i32
    %20 = arith.cmpi ne, %19, %c0_i32_14 : i32
    scf.if %20 {
      %c0_15 = arith.constant 0 : index
      %c0_16 = arith.constant 0 : index
      %21 = vector.load %arg6[%c0_15, %c0_16] : memref<16x128xf32, #tpu.memory_space<vmem>>, vector<16x128xf32>
      %c0_17 = arith.constant 0 : index
      %c0_18 = arith.constant 0 : index
      %22 = vector.load %arg5[%c0_17, %c0_18] : memref<16x128xf32, #tpu.memory_space<vmem>>, vector<16x128xf32>
      tpu.vector_store %arg5[%c0_17, %c0_18], %21 {strides = array<i32>} : memref<16x128xf32, #tpu.memory_space<vmem>>, vector<16x128xf32>,
    } else {
    }
    return
  }
  func.func @transform_0(%arg0: i32, %arg1: i32) -> (i32, i32) {
    %c0_i32 = arith.constant 0 : i32
    %c0_i32_0 = arith.constant 0 : i32
    return %arg0, %c0_i32 : i32, i32
  }
  func.func @transform_1(%arg0: i32, %arg1: i32) -> (i32, i32, i32) {
    %c0_i32 = arith.constant 0 : i32
    %c0_i32_0 = arith.constant 0 : i32
    %c0_i32_1 = arith.constant 0 : i32
    return %arg1, %c0_i32, %c0_i32_0 : i32, i32, i32
  }
  func.func @transform_2(%arg0: i32, %arg1: i32) -> (i32, i32) {
    %c0_i32 = arith.constant 0 : i32
    %c0_i32_0 = arith.constant 0 : i32
    return %arg1, %c0_i32 : i32, i32
  }
  func.func @transform_3(%arg0: i32, %arg1: i32) -> (i32, i32) {
    %c0_i32 = arith.constant 0 : i32
    %c0_i32_0 = arith.constant 0 : i32
    return %arg0, %c0_i32 : i32, i32
  }
}

</mosaic_0001>

<bundles_post_ra>
// kernel: tpu_custom_call.1
= control target key start
LH: loop header
LB: loop body
LE: loop exit
PB: predicated region body
PF: predicated region fallthrough
CT: control target
= control target key end

     0   :  { %8 = vsyncpa [#allocation4], 0  ;;  %s421_s0 = inlined_call_operand.hbm [shape: f32[16,128], index: 0, kind: input, shape index: {}]   ;;  %s422_s1 = inlined_call_operand.hbm [shape: f32[1,128,128], index: 1, kind: input, shape index: {}]   ;;  %s423_s2 = inlined_call_operand.hbm [shape: f32[128,128], index: 2, kind: input, shape index: {}]   ;;  %s424_s3 = inlined_call_operand.hbm [shape: f32[16,128], index: 3, kind: output, shape index: {}]  }
   0x1   :  { %9 = vsyncpa [#allocation7], 0 }
   0x2   :  { %10 = vsyncpa [#allocation5], 0  ;;  %s28_s14 = sshll.u32 %s422_s1, 4  ;;  %s371_s15 = smov [#allocation6]   ;;  %s29_s14 = int_to_ptr.hbm [resolvable:$true] %s28_s14 }
   0x3   :  { %s30_s16 = sshll.u32 %s371_s15, 4  ;;  %s15_s19 = sshll.u32 %s421_s0, 4  ;;  %s31_s16 = int_to_ptr.vmem [resolvable:$true] %s30_s16  ;;  %s16_s19 = int_to_ptr.hbm [resolvable:$true] %s15_s19 }
   0x4   :  { %s372_s20 = smov 128   ;;  %s373_s21 = smov 8  }
   0x5   :  { %36 = dma.hbm_to_vmem [thread:$0]  %s29_s14, 2048, %s31_s16, [#allocation7], %s372_s20, %s372_s20, %s373_s21  }
   0x6   :  { %s374_s22 = smov [#allocation3]   ;;  %s41_s1 = sshll.u32 %s423_s2, 4  ;;  %s42_s1 = int_to_ptr.hbm [resolvable:$true] %s41_s1 }
   0x7   :  { %s17_s23 = sshll.u32 %s374_s22, 4  ;;  %s375_s0 = smov [#allocation8]   ;;  %s18_s23 = int_to_ptr.vmem [resolvable:$true] %s17_s23 }
   0x8   :  { %23 = dma.hbm_to_vmem [thread:$0]  %s16_s19, 256, %s18_s23, [#allocation4], %s372_s20, %s372_s20, %s373_s21  }
   0x9   :  { %s43_s26 = sshll.u32 %s375_s0, 4  ;;  %s44_s26 = int_to_ptr.vmem [resolvable:$true] %s43_s26 }
   0xa   :  { %49 = dma.hbm_to_vmem [thread:$0]  %s42_s1, 2048, %s44_s26, [#allocation7], %s372_s20, %s372_s20, %s373_s21  }
   0xb   :  { %365 = dma.done.wait [#allocation4], 256  }
   0xc   :  { %366 = vsyncadd [#allocation4], 4294967040 }
   0xd   :  { %367 = dma.done.wait [#allocation7], 4096  }
   0xe   :  { %368 = vsyncadd [#allocation7], 4294963200  ;;  %v85_v0 = vld [vmem:[#allocation6 + $0x78] sm:$0xff]  ;;  %v84_v1 = vld [vmem:[#allocation6 + $0x70] sm:$0xff]  ;;  %s376_s2 = smov [#allocation9]   ;;  %s207_s30 = sshll.u32 %s424_s3, 4  ;;  %s208_s30 = int_to_ptr.hbm [resolvable:$true] %s207_s30 }
   0xf   :  { %86 = vmatpush.msra.mxu0 %v85_v0  ;;  %223 = vmatpush.msra.mxu2 %v85_v0  ;;  %v83_v2 = vld [vmem:[#allocation6 + $0x68] sm:$0xff]  ;;  %v82_v3 = vld [vmem:[#allocation6 + $0x60] sm:$0xff]  ;;  %v81_v4 = vld [vmem:[#allocation6 + $0x58] sm:$0xff]  ;;  %s205_s27 = sshll.u32 %s376_s2, 4  ;;  %s206_s27 = int_to_ptr.vmem [resolvable:$true] %s205_s27 }
  0x10   :  { %v80_v5 = vld [vmem:[#allocation6 + $0x50] sm:$0xff]  ;;  %v79_v6 = vld [vmem:[#allocation6 + $0x48] sm:$0xff]  ;;  %v78_v7 = vld [vmem:[#allocation6 + $0x40] sm:$0xff] }
  0x11   :  { %87 = vmatpush.msra.mxu0 %v84_v1  ;;  %224 = vmatpush.msra.mxu2 %v84_v1  ;;  %v77_v8 = vld [vmem:[#allocation6 + $0x38] sm:$0xff]  ;;  %v76_v9 = vld [vmem:[#allocation6 + $0x30] sm:$0xff]  ;;  %v75_v10 = vld [vmem:[#allocation6 + $0x28] sm:$0xff] }
  0x12   :  { %v74_v11 = vld [vmem:[#allocation6 + $0x20] sm:$0xff]  ;;  %v73_v12 = vld [vmem:[#allocation6 + $0x18] sm:$0xff]  ;;  %v72_v13 = vld [vmem:[#allocation6 + $0x10] sm:$0xff] }
  0x13   :  { %88 = vmatpush.msra.mxu0 %v83_v2  ;;  %225 = vmatpush.msra.mxu2 %v83_v2  ;;  %v71_v14 = vld [vmem:[#allocation6 + $0x8] sm:$0xff]  ;;  %v70_v15 = vld [vmem:[#allocation6] sm:$0xff]  ;;  %v68_v16 = vld [vmem:[#allocation3] sm:$0xff] }
  0x14   :  { %v69_v17 = vld [vmem:[#allocation3 + $0x8] sm:$0xff]  ;;  %v165_v19 = vld [vmem:[#allocation8 + $0x70] sm:$0xff]  ;;  %v164_v20 = vld [vmem:[#allocation8 + $0x68] sm:$0xff] }
  0x15   :  { %89 = vmatpush.msra.mxu0 %v82_v3  ;;  %226 = vmatpush.msra.mxu2 %v82_v3  ;;  %v166_v18 = vld [vmem:[#allocation8 + $0x78] sm:$0xff]  ;;  %v163_v21 = vld [vmem:[#allocation8 + $0x60] sm:$0xff]  ;;  %v161_v23 = vld [vmem:[#allocation8 + $0x50] sm:$0xff] }
  0x16   :  { %167 = vmatpush.msra.mxu1 %v166_v18  ;;  %239 = vmatpush.msra.mxu3 %v166_v18  ;;  %v162_v22 = vld [vmem:[#allocation8 + $0x58] sm:$0xff]  ;;  %v160_v24 = vld [vmem:[#allocation8 + $0x48] sm:$0xff]  ;;  %v159_v25 = vld [vmem:[#allocation8 + $0x40] sm:$0xff] }
  0x17   :  { %90 = vmatpush.msra.mxu0 %v81_v4  ;;  %227 = vmatpush.msra.mxu2 %v81_v4  ;;  %v158_v26 = vld [vmem:[#allocation8 + $0x38] sm:$0xff]  ;;  %v157_v27 = vld [vmem:[#allocation8 + $0x30] sm:$0xff]  ;;  %v156_v28 = vld [vmem:[#allocation8 + $0x28] sm:$0xff] }
  0x18   :  { %168 = vmatpush.msra.mxu1 %v165_v19  ;;  %240 = vmatpush.msra.mxu3 %v165_v19  ;;  %v155_v29 = vld [vmem:[#allocation8 + $0x20] sm:$0xff]  ;;  %v154_v30 = vld [vmem:[#allocation8 + $0x18] sm:$0xff]  ;;  %v153_v31 = vld [vmem:[#allocation8 + $0x10] sm:$0xff] }
  0x19   :  { %91 = vmatpush.msra.mxu0 %v80_v5  ;;  %228 = vmatpush.msra.mxu2 %v80_v5  ;;  %v152_v32 = vld [vmem:[#allocation8 + $0x8] sm:$0xff]  ;;  %v151_v33 = vld [vmem:[#allocation8] sm:$0xff] }
  0x1a   :  { %169 = vmatpush.msra.mxu1 %v164_v20  ;;  %241 = vmatpush.msra.mxu3 %v164_v20 }
  0x1b   :  { %92 = vmatpush.msra.mxu0 %v79_v6  ;;  %229 = vmatpush.msra.mxu2 %v79_v6 }
  0x1c   :  { %170 = vmatpush.msra.mxu1 %v163_v21  ;;  %242 = vmatpush.msra.mxu3 %v163_v21 }
  0x1d   :  { %93 = vmatpush.msra.mxu0 %v78_v7  ;;  %230 = vmatpush.msra.mxu2 %v78_v7 }
  0x1e   :  { %171 = vmatpush.msra.mxu1 %v162_v22  ;;  %243 = vmatpush.msra.mxu3 %v162_v22 }
  0x1f   :  { %94 = vmatpush.msra.mxu0 %v77_v8  ;;  %231 = vmatpush.msra.mxu2 %v77_v8 }
  0x20   :  { %172 = vmatpush.msra.mxu1 %v161_v23  ;;  %244 = vmatpush.msra.mxu3 %v161_v23 }
  0x21   :  { %95 = vmatpush.msra.mxu0 %v76_v9  ;;  %232 = vmatpush.msra.mxu2 %v76_v9 }
  0x22   :  { %173 = vmatpush.msra.mxu1 %v160_v24  ;;  %245 = vmatpush.msra.mxu3 %v160_v24 }
  0x23   :  { %96 = vmatpush.msra.mxu0 %v75_v10  ;;  %233 = vmatpush.msra.mxu2 %v75_v10 }
  0x24   :  { %174 = vmatpush.msra.mxu1 %v159_v25  ;;  %246 = vmatpush.msra.mxu3 %v159_v25 }
  0x25   :  { %97 = vmatpush.msra.mxu0 %v74_v11  ;;  %234 = vmatpush.msra.mxu2 %v74_v11 }
  0x26   :  { %175 = vmatpush.msra.mxu1 %v158_v26  ;;  %247 = vmatpush.msra.mxu3 %v158_v26 }
  0x27   :  { %98 = vmatpush.msra.mxu0 %v73_v12  ;;  %235 = vmatpush.msra.mxu2 %v73_v12 }
  0x28   :  { %176 = vmatpush.msra.mxu1 %v157_v27  ;;  %248 = vmatpush.msra.mxu3 %v157_v27 }
  0x29   :  { %99 = vmatpush.msra.mxu0 %v72_v13  ;;  %236 = vmatpush.msra.mxu2 %v72_v13 }
  0x2a   :  { %177 = vmatpush.msra.mxu1 %v156_v28  ;;  %249 = vmatpush.msra.mxu3 %v156_v28 }
  0x2b   :  { %100 = vmatpush.msra.mxu0 %v71_v14  ;;  %237 = vmatpush.msra.mxu2 %v71_v14 }
  0x2c   :  { %178 = vmatpush.msra.mxu1 %v155_v29  ;;  %250 = vmatpush.msra.mxu3 %v155_v29 }
  0x2d   :  { %101 = vmatpush.msra.mxu0 %v70_v15  ;;  %238 = vmatpush.msra.mxu2 %v70_v15 }
  0x2e   :  { %102 = vmatmul.f32.vlgmr.msra.gmra.mxu0 %v68_v16  ;;  %105 = vmatmul.f32.vlgmr.msra.gmra.mxu2 %v69_v17 }
  0x2f   :  { %179 = vmatpush.msra.mxu1 %v154_v30  ;;  %251 = vmatpush.msra.mxu3 %v154_v30 }
  0x31   :  { %180 = vmatpush.msra.mxu1 %v153_v31  ;;  %252 = vmatpush.msra.mxu3 %v153_v31 }
  0x33   :  { %181 = vmatpush.msra.mxu1 %v152_v32  ;;  %253 = vmatpush.msra.mxu3 %v152_v32 }
  0x35   :  { %182 = vmatpush.msra.mxu1 %v151_v33  ;;  %254 = vmatpush.msra.mxu3 %v151_v33 }
  0xab   :  { %v103_v34 = vpop.f32.mrf.mxu0 }
  0xac   :  { %v221_v35 = vmul.f32 -1.442695, %v103_v34 }
  0xae   :  { %261 = vpow2.f32 %v221_v35 }
  0xb1   :  { %v106_v36 = vpop.f32.mrf.mxu2 }
  0xb2   :  { %v222_v37 = vmul.f32 -1.442695, %v106_v36 }
  0xb4   :  { %v262_v38 = vpop.eup %261  ;;  %263 = vpow2.f32 %v222_v37 }
  0xb5   :  { %v115_v39 = vadd.f32 1.0, %v262_v38 }
  0xb7   :  { %265 = vrcp.f32 %v115_v39  ;;  %v128_v44 = vand.u32 2147483648, %v115_v39  ;;  %vm122_vm0 = vweird.f32 %v115_v39  ;;  %v126_v46 = vand.u32 2147483647, %v115_v39 }
  0xb9   :  { %v129_v49 = vor.u32 1.1754944e-38, %v128_v44  ;;  %vm127_vm3 = vcmp.eq.f32.partialorder %v126_v46, 8.507059e+37 }
  0xba   :  { %v264_v40 = vpop.eup %263 }
  0xbb   :  { %v116_v41 = vadd.f32 1.0, %v264_v40 }
  0xbd   :  { %v266_v42 = vpop.eup %265  ;;  %267 = vrcp.f32 %v116_v41  ;;  %v143_v55 = vand.u32 2147483648, %v116_v41  ;;  %v141_v58 = vand.u32 2147483647, %v116_v41  ;;  %vm137_vm5 = vweird.f32 %v116_v41 }
  0xbe   :  { %v118_v43 = vmul.f32 %v266_v42, %v115_v39  ;;  %vm123_vm1 = vweird.f32 %v266_v42 }
  0xbf   :  { %vm124_vm2 = vmor %vm122_vm0, %vm123_vm1  ;;  %v144_v60 = vor.u32 1.1754944e-38, %v143_v55  ;;  %vm142_vm7 = vcmp.eq.f32.partialorder %v141_v58, 8.507059e+37 }
  0xc0   :  { %v119_v45 = vsub.f32 1.0, %v118_v43 }
  0xc2   :  { %v120_v47 = vmul.f32 %v266_v42, %v119_v45 }
  0xc3   :  { %v268_v48 = vpop.eup %267 }
  0xc4   :  { %v121_v50 = vadd.f32 %v266_v42, %v120_v47  ;;  %v133_v51 = vmul.f32 %v268_v48, %v116_v41  ;;  %vm138_vm4 = vweird.f32 %v268_v48 }
  0xc5   :  { %vm139_vm6 = vmor %vm137_vm5, %vm138_vm4 }
  0xc6   :  { %v125_v52 = vsel %vm124_vm2, %v266_v42, %v121_v50  ;;  %v134_v53 = vsub.f32 1.0, %v133_v51 }
  0xc7   :  { %v130_v54 = vsel %vm127_vm3, %v129_v49, %v125_v52 }
  0xc8   :  { %v147_v56 = vmul.f32 %v130_v54, %v103_v34  ;;  %v135_v57 = vmul.f32 %v268_v48, %v134_v53 }
  0xca   :  { %v136_v59 = vadd.f32 %v268_v48, %v135_v57  ;;  %183 = vmatmul.f32.vlgmr.msra.gmra.mxu1 %v147_v56 }
  0xcc   :  { %v140_v61 = vsel %vm139_vm6, %v268_v48, %v136_v59 }
  0xcd   :  { %v145_v62 = vsel %vm142_vm7, %v144_v60, %v140_v61 }
  0xce   :  { %v148_v63 = vmul.f32 %v145_v62, %v106_v36 }
  0xd0   :  { %186 = vmatmul.f32.vlgmr.msra.gmra.mxu3 %v148_v63 }
 0x147   :  { %v184_v0 = vpop.f32.mrf.mxu1 }
 0x148   :  { %199 = vst [vmem:[#allocation9] sm:$0xff] %v184_v0 }
 0x153   :  { %v187_v1 = vpop.f32.mrf.mxu3 }
 0x154   :  { %200 = vst [vmem:[#allocation9 + $0x8] sm:$0xff] %v187_v1 }
 0x155   :  { %213 = dma.vmem_to_hbm [thread:$0]  %s206_s27, 256, %s208_s30, [#allocation5], %s372_s20, %s372_s20, %s373_s21  }
 0x156   :  { %369 = dma.done.wait [#allocation5], 256  }
 0x157   :  { %370 = vsyncadd [#allocation5], 4294967040 }
 0x158   :  { %218 = vsyncpa [#allocation4], 1 }
 0x159   :  { %219 = vsyncpa [#allocation7], 1 }
 0x15a   :  { %220 = vsyncpa [#allocation5], 1 }

</bundles_post_ra>
